<compile_context>
chip_gen: v6e
topology: v6e:2x2x1
jax: 0.10.0
libtpu: 0.0.40
codegen_flags: <defaults>
</compile_context>

<pallas_src>
import math
from functools import partial

import jax
import jax.numpy as jnp
import numpy as np
from jax import lax
from jax.experimental import pallas as pl
from jax.experimental.pallas import tpu as pltpu


def _mha_kernel(x_ref, wqkv_ref, bqkv_ref, wo_ref, bo_ref, o_ref, acc_ref, *,
                head_dim: int, compute_dtype):
    """One (batch b, head h) grid step.

    x_ref:    (S, H)       input block (resident across the h axis)
    wqkv_ref: (H, 3d)      head h's fused Q|K|V output-column block (Q pre-scaled)
    bqkv_ref: (1, 3d)      matching f32 bias
    wo_ref:   (d, H)       head h's input-row block of the output projection
    bo_ref:   (1, H)       output projection bias (f32)
    o_ref:    (S, H)       output block (constant over h -> accumulator axis)
    acc_ref:  (S, H) f32   VMEM accumulator scratch (persists across h)
    """
    h = pl.program_id(1)
    d = head_dim
    exact = jnp.dtype(compute_dtype) == jnp.dtype(jnp.float32)

    @pl.when(h == 0)
    def _():
        acc_ref[...] = jnp.zeros_like(acc_ref)

    x = x_ref[...].astype(compute_dtype)                              # (S, H)

    # Fused QKV projection: one MXU pass with N = 3d.
    qkv = jnp.dot(x, wqkv_ref[...],
                  preferred_element_type=jnp.float32) + bqkv_ref[...]  # (S, 3d) f32
    q = qkv[:, :d]                  # 1/sqrt(d) already folded into Wq / bq
    k = qkv[:, d:2 * d]
    v = qkv[:, 2 * d:]

    # QK^T as a contraction over head_dim — no materialized k transpose.
    scores = lax.dot_general(
        q.astype(compute_dtype), k.astype(compute_dtype),
        dimension_numbers=(((1,), (1,)), ((), ())),
        preferred_element_type=jnp.float32)                            # (S, S) f32

    # Softmax with deferred normalization: scale the (S, d) PV result by
    # 1/denom instead of the (S, S) probabilities.
    m = jnp.max(scores, axis=-1, keepdims=True)
    p = jnp.exp(scores - m)                                            # (S, S) f32
    denom = jnp.sum(p, axis=-1, keepdims=True)
    inv = pl.reciprocal(denom, approx=not exact)                       # EUP on fast path

    head_out = jnp.dot(p.astype(compute_dtype), v.astype(compute_dtype),
                       preferred_element_type=jnp.float32)             # (S, d) f32
    head_out = head_out * inv

    # Per-head decomposition of the output projection accumulated into the
    # resident (S, H) f32 accumulator — no lane-dim concatenate of heads.
    acc_ref[...] += jnp.dot(head_out.astype(compute_dtype), wo_ref[...],
                            preferred_element_type=jnp.float32)

    @pl.when(h == pl.num_programs(1) - 1)
    def _():
        o_ref[...] = (acc_ref[...] + bo_ref[...]).astype(o_ref.dtype)


def _prep_params(params, num_heads: int, head_dim: int, compute_dtype):
    """One-time host-side re-layout of the nn.Linear parameters."""
    H = num_heads * head_dim
    scale = 1.0 / math.sqrt(head_dim)

    def split_cols(w):  # [H, H] -> (nh, H, d): head h's output columns
        return w.reshape(H, num_heads, head_dim).transpose(1, 0, 2)

    wqkv = jnp.concatenate(
        [split_cols(params["wq"] * scale),          # fold 1/sqrt(d) into Wq
         split_cols(params["wk"]),
         split_cols(params["wv"])], axis=-1).astype(compute_dtype)      # (nh, H, 3d)
    bqkv = jnp.concatenate(
        [(params["bq"] * scale).reshape(num_heads, head_dim),
         params["bk"].reshape(num_heads, head_dim),
         params["bv"].reshape(num_heads, head_dim)],
        axis=-1).reshape(num_heads, 1, 3 * head_dim)                    # f32
    wo = params["wo"].reshape(num_heads, head_dim, H).astype(compute_dtype)
    bo = params["bo"].reshape(1, H)                                     # f32
    return wqkv, bqkv, wo, bo


def _vmem_limit_bytes(S, H, d, compute_dtype):
    """Rough working-set estimate; only raise the scoped limit when the
    smallest default (~16 MiB on v5e) would not cover it."""
    cbytes = jnp.dtype(compute_dtype).itemsize
    blocks = 2 * 2 * S * H * 4                           # double-buffered x / out (f32)
    weights = 2 * ((H * 3 * d + d * H) * cbytes + (3 * d + H) * 4)
    scratch = S * H * 4
    interm = (2 * S * 3 * d + 2 * S * S + 2 * S * d + S * H) * 4
    budget = int(1.25 * (blocks + weights + scratch + interm)) + (2 << 20)
    if budget <= (16 << 20):
        return None
    # TODO(synk): large-S configs need the flash-style KV tiling to fit v7x.
    return min(budget, 96 << 20)


def mha_forward(x, params, num_heads: int, *, compute_dtype=jnp.bfloat16):
    """x: (B, S, H) float32. params: weights as [in, out], biases as [H]."""
    B, S, H = x.shape
    assert H % num_heads == 0
    d = H // num_heads

    wqkv, bqkv, wo, bo = _prep_params(params, num_heads, d, compute_dtype)
    kernel = partial(_mha_kernel, head_dim=d, compute_dtype=compute_dtype)

    return pl.pallas_call(
        kernel,
        out_shape=jax.ShapeDtypeStruct((B, S, H), x.dtype),
        grid_spec=pltpu.PrefetchScalarGridSpec(
            num_scalar_prefetch=0,
            # Heads on the grid: one head's weights resident at a time; the
            # next head's weight DMA overlaps the current head's compute.
            grid=(B, num_heads),
            in_specs=[
                pl.BlockSpec((None, S, H), lambda b, h: (b, 0, 0)),      # x
                pl.BlockSpec((None, H, 3 * d), lambda b, h: (h, 0, 0)),  # wqkv
                pl.BlockSpec((None, 1, 3 * d), lambda b, h: (h, 0, 0)),  # bqkv
                pl.BlockSpec((None, d, H), lambda b, h: (h, 0, 0)),      # wo
                pl.BlockSpec((1, H), lambda b, h: (0, 0)),               # bo
            ],
            out_specs=pl.BlockSpec((None, S, H), lambda b, h: (b, 0, 0)),
            scratch_shapes=[pltpu.VMEM((S, H), jnp.float32)],
        ),
        compiler_params=pltpu.CompilerParams(
            dimension_semantics=("parallel", "arbitrary"),
            vmem_limit_bytes=_vmem_limit_bytes(S, H, d, compute_dtype),
        ),
    )(x, wqkv, bqkv, wo, bo)


def mha_reference(x, params, num_heads: int):
    """Pure-JAX f32 reference mirroring the PyTorch forward."""
    B, S, H = x.shape
    d = H // num_heads
    scale = 1.0 / math.sqrt(d)

    def lin(t, w, b):
        return t @ w + b

    q = lin(x, params["wq"], params["bq"]).reshape(B, S, num_heads, d).transpose(0, 2, 1, 3)
    k = lin(x, params["wk"], params["bk"]).reshape(B, S, num_heads, d).transpose(0, 2, 1, 3)
    v = lin(x, params["wv"], params["bv"]).reshape(B, S, num_heads, d).transpose(0, 2, 1, 3)
    scores = jnp.einsum("bhqd,bhkd->bhqk", q, k) * scale
    weights = jax.nn.softmax(scores, axis=-1)
    out = jnp.einsum("bhqk,bhkd->bhqd", weights, v)
    out = out.transpose(0, 2, 1, 3).reshape(B, S, H)
    return lin(out, params["wo"], params["bo"])


def init_params(key, hidden_size: int):
    """Same shapes as the four nn.Linear(hidden, hidden); weights stored [in, out]."""
    ks = jax.random.split(key, 8)
    bound = 1.0 / math.sqrt(hidden_size)

    def w(k):
        return jax.random.uniform(k, (hidden_size, hidden_size), jnp.float32, -bound, bound)

    def b(k):
        return jax.random.uniform(k, (hidden_size,), jnp.float32, -bound, bound)

    return {
        "wq": w(ks[0]), "bq": b(ks[1]),
        "wk": w(ks[2]), "bk": b(ks[3]),
        "wv": w(ks[4]), "bv": b(ks[5]),
        "wo": w(ks[6]), "bo": b(ks[7]),
    }


if __name__ == "__main__":
    # NOTE: toy, non-lane-aligned shape for correctness only; benchmark with
    # H a multiple of 128 and head_dim >= 64 (see perf notes above).
    B, S, H, NUM_HEADS = 2, 8, 32, 4

    key = jax.random.PRNGKey(0)
    kx, kp = jax.random.split(key)
    x = jax.random.normal(kx, (B, S, H), dtype=jnp.float32)
    params = init_params(kp, H)

    ref = mha_reference(x, params, NUM_HEADS)

    # Reference-parity path: f32 MXU operands, exact reciprocal.
    out_f32 = jax.block_until_ready(
        mha_forward(x, params, NUM_HEADS, compute_dtype=jnp.float32))
    np.testing.assert_allclose(np.asarray(out_f32), np.asarray(ref),
                               atol=1e-5, rtol=1e-5)

    # Fast path: bf16 MXU operands with f32 accumulation.
    out_bf16 = jax.block_until_ready(
        mha_forward(x, params, NUM_HEADS, compute_dtype=jnp.bfloat16))
    np.testing.assert_allclose(np.asarray(out_bf16), np.asarray(ref),
                               atol=5e-2, rtol=5e-2)

    print("KERNEL_OK")
</pallas_src>

<mosaic_0001>
module attributes {stable_mosaic.version = 11 : i64} {
  func.func @_mha_kernel(%arg0: i32, %arg1: i32, %arg2: memref<1x8x32xf32, #tpu.memory_space<vmem>>, %arg3: memref<1x32x24xf32, #tpu.memory_space<vmem>>, %arg4: memref<1x1x24xf32, #tpu.memory_space<vmem>>, %arg5: memref<1x8x32xf32, #tpu.memory_space<vmem>>, %arg6: memref<1x32xf32, #tpu.memory_space<vmem>>, %arg7: memref<1x8x32xf32, #tpu.memory_space<vmem>>, %arg8: memref<8x32xf32, #tpu.memory_space<vmem>>) attributes {dimension_semantics = [#tpu.dimension_semantics<parallel>, #tpu.dimension_semantics<arbitrary>], iteration_bounds = array<i64: 2, 4>, scalar_prefetch = 0 : i64, scratch_operands = 1 : i64, tpu.core_type = #tpu.core_type<tc>, window_params = [{transform_indices = @transform_0, window_bounds = array<i64: 1, 8, 32>}, {transform_indices = @transform_1, window_bounds = array<i64: 1, 32, 24>}, {transform_indices = @transform_2, window_bounds = array<i64: 1, 1, 24>}, {transform_indices = @transform_3, window_bounds = array<i64: 1, 8, 32>}, {pipeline_mode = #tpu.pipeline_mode<synchronous>, transform_indices = @transform_4, window_bounds = array<i64: 1, 32>}, {transform_indices = @transform_5, window_bounds = array<i64: 1, 8, 32>}]} {
    %c0_i32 = arith.constant 0 : i32
    %0 = arith.cmpi eq, %arg1, %c0_i32 : i32
    %1 = arith.extui %0 : i1 to i32
    %c0_i32_0 = arith.constant 0 : i32
    %2 = arith.cmpi ne, %1, %c0_i32_0 : i32
    scf.if %2 {
      %cst_22 = arith.constant 0.000000e+00 : f32
      %36 = vector.broadcast %cst_22 : f32 to vector<8x32xf32>
      %c0_23 = arith.constant 0 : index
      %c0_24 = arith.constant 0 : index
      %37 = vector.load %arg8[%c0_23, %c0_24] : memref<8x32xf32, #tpu.memory_space<vmem>>, vector<8x32xf32>
      tpu.vector_store %arg8[%c0_23, %c0_24], %36 {strides = array<i32>} : memref<8x32xf32, #tpu.memory_space<vmem>>, vector<8x32xf32>,
    } else {
    }
    %c0 = arith.constant 0 : index
    %c0_1 = arith.constant 0 : index
    %c0_2 = arith.constant 0 : index
    %3 = vector.load %arg2[%c0, %c0_1, %c0_2] : memref<1x8x32xf32, #tpu.memory_space<vmem>>, vector<1x8x32xf32>
    %4 = vector.shape_cast %3 : vector<1x8x32xf32> to vector<8x32xf32>
    %c0_3 = arith.constant 0 : index
    %c0_4 = arith.constant 0 : index
    %c0_5 = arith.constant 0 : index
    %5 = vector.load %arg3[%c0_3, %c0_4, %c0_5] : memref<1x32x24xf32, #tpu.memory_space<vmem>>, vector<1x32x24xf32>
    %6 = vector.shape_cast %5 : vector<1x32x24xf32> to vector<32x24xf32>
    %cst = arith.constant dense<0.000000e+00> : vector<8x24xf32>
    %7 = tpu.matmul %4, %6, %cst {dimension_numbers = #tpu.dot_dimension_numbers<[1], [0], [0], [1], [0, 0, 1, 1], [], []>} : vector<8x32xf32>, vector<32x24xf32>, vector<8x24xf32> -> vector<8x24xf32>
    %c0_6 = arith.constant 0 : index
    %c0_7 = arith.constant 0 : index
    %c0_8 = arith.constant 0 : index
    %8 = vector.load %arg4[%c0_6, %c0_7, %c0_8] : memref<1x1x24xf32, #tpu.memory_space<vmem>>, vector<1x1x24xf32>
    %9 = vector.shape_cast %8 : vector<1x1x24xf32> to vector<1x24xf32>
    %10 = vector.broadcast %9 : vector<1x24xf32> to vector<8x24xf32>
    %11 = arith.addf %7, %10 : vector<8x24xf32>
    %12 = vector.extract_strided_slice %11 {offsets = [0, 0], sizes = [8, 8], strides = [1, 1]} : vector<8x24xf32> to vector<8x8xf32>
    %13 = vector.extract_strided_slice %11 {offsets = [0, 8], sizes = [8, 8], strides = [1, 1]} : vector<8x24xf32> to vector<8x8xf32>
    %14 = vector.extract_strided_slice %11 {offsets = [0, 16], sizes = [8, 8], strides = [1, 1]} : vector<8x24xf32> to vector<8x8xf32>
    %cst_9 = arith.constant dense<0.000000e+00> : vector<8x8xf32>
    %15 = tpu.matmul %12, %13, %cst_9 {dimension_numbers = #tpu.dot_dimension_numbers<[1], [1], [0], [0], [0, 0, 1, 0], [], []>} : vector<8x8xf32>, vector<8x8xf32>, vector<8x8xf32> -> vector<8x8xf32>
    %cst_10 = arith.constant dense<0xFF800000> : vector<8xf32>
    %16 = vector.multi_reduction <maximumf>, %15, %cst_10 [1] : vector<8x8xf32> to vector<8xf32>
    %17 = vector.shape_cast %16 : vector<8xf32> to vector<8x1xf32>
    %18 = vector.broadcast %17 : vector<8x1xf32> to vector<8x8xf32>
    %19 = arith.subf %15, %18 : vector<8x8xf32>
    %20 = math.exp %19 : vector<8x8xf32>
    %cst_11 = arith.constant dense<0.000000e+00> : vector<8xf32>
    %21 = vector.multi_reduction <add>, %20, %cst_11 [1] : vector<8x8xf32> to vector<8xf32>
    %22 = vector.shape_cast %21 : vector<8xf32> to vector<8x1xf32>
    %23 = tpu.reciprocal %22 : vector<8x1xf32> -> vector<8x1xf32>
    %cst_12 = arith.constant dense<0.000000e+00> : vector<8x8xf32>
    %24 = tpu.matmul %20, %14, %cst_12 {dimension_numbers = #tpu.dot_dimension_numbers<[1], [0], [0], [1], [0, 0, 1, 1], [], []>} : vector<8x8xf32>, vector<8x8xf32>, vector<8x8xf32> -> vector<8x8xf32>
    %25 = vector.broadcast %23 : vector<8x1xf32> to vector<8x8xf32>
    %26 = arith.mulf %24, %25 : vector<8x8xf32>
    %c0_13 = arith.constant 0 : index
    %c0_14 = arith.constant 0 : index
    %27 = vector.load %arg8[%c0_13, %c0_14] : memref<8x32xf32, #tpu.memory_space<vmem>>, vector<8x32xf32>
    %c0_15 = arith.constant 0 : index
    %c0_16 = arith.constant 0 : index
    %c0_17 = arith.constant 0 : index
    %28 = vector.load %arg5[%c0_15, %c0_16, %c0_17] : memref<1x8x32xf32, #tpu.memory_space<vmem>>, vector<1x8x32xf32>
    %29 = vector.shape_cast %28 : vector<1x8x32xf32> to vector<8x32xf32>
    %cst_18 = arith.constant dense<0.000000e+00> : vector<8x32xf32>
    %30 = tpu.matmul %26, %29, %cst_18 {dimension_numbers = #tpu.dot_dimension_numbers<[1], [0], [0], [1], [0, 0, 1, 1], [], []>} : vector<8x8xf32>, vector<8x32xf32>, vector<8x32xf32> -> vector<8x32xf32>
    %31 = arith.addf %27, %30 : vector<8x32xf32>
    %c0_19 = arith.constant 0 : index
    %c0_20 = arith.constant 0 : index
    %32 = vector.load %arg8[%c0_19, %c0_20] : memref<8x32xf32, #tpu.memory_space<vmem>>, vector<8x32xf32>
    tpu.vector_store %arg8[%c0_19, %c0_20], %31 {strides = array<i32>} : memref<8x32xf32, #tpu.memory_space<vmem>>, vector<8x32xf32>,
    %c3_i32 = arith.constant 3 : i32
    %33 = arith.cmpi eq, %arg1, %c3_i32 : i32
    %34 = arith.extui %33 : i1 to i32
    %c0_i32_21 = arith.constant 0 : i32
    %35 = arith.cmpi ne, %34, %c0_i32_21 : i32
    scf.if %35 {
      %c0_22 = arith.constant 0 : index
      %c0_23 = arith.constant 0 : index
      %36 = vector.load %arg8[%c0_22, %c0_23] : memref<8x32xf32, #tpu.memory_space<vmem>>, vector<8x32xf32>
      %c0_24 = arith.constant 0 : index
      %c0_25 = arith.constant 0 : index
      %37 = vector.load %arg6[%c0_24, %c0_25] : memref<1x32xf32, #tpu.memory_space<vmem>>, vector<1x32xf32>
      %38 = vector.broadcast %37 : vector<1x32xf32> to vector<8x32xf32>
      %39 = arith.addf %36, %38 : vector<8x32xf32>
      %c0_26 = arith.constant 0 : index
      %c0_27 = arith.constant 0 : index
      %c0_28 = arith.constant 0 : index
      %40 = vector.load %arg7[%c0_26, %c0_27, %c0_28] : memref<1x8x32xf32, #tpu.memory_space<vmem>>, vector<1x8x32xf32>
      %41 = vector.shape_cast %40 : vector<1x8x32xf32> to vector<8x32xf32>
      %42 = vector.shape_cast %39 : vector<8x32xf32> to vector<1x8x32xf32>
      tpu.vector_store %arg7[%c0_26, %c0_27, %c0_28], %42 {strides = array<i32>} : memref<1x8x32xf32, #tpu.memory_space<vmem>>, vector<1x8x32xf32>,
    } else {
    }
    return
  }
  func.func @transform_0(%arg0: i32, %arg1: i32) -> (i32, i32, i32) {
    %c0_i32 = arith.constant 0 : i32
    %c0_i32_0 = arith.constant 0 : i32
    %c0_i32_1 = arith.constant 0 : i32
    return %arg0, %c0_i32, %c0_i32_0 : i32, i32, i32
  }
  func.func @transform_1(%arg0: i32, %arg1: i32) -> (i32, i32, i32) {
    %c0_i32 = arith.constant 0 : i32
    %c0_i32_0 = arith.constant 0 : i32
    %c0_i32_1 = arith.constant 0 : i32
    return %arg1, %c0_i32, %c0_i32_0 : i32, i32, i32
  }
  func.func @transform_2(%arg0: i32, %arg1: i32) -> (i32, i32, i32) {
    %c0_i32 = arith.constant 0 : i32
    %c0_i32_0 = arith.constant 0 : i32
    %c0_i32_1 = arith.constant 0 : i32
    return %arg1, %c0_i32, %c0_i32_0 : i32, i32, i32
  }
  func.func @transform_3(%arg0: i32, %arg1: i32) -> (i32, i32, i32) {
    %c0_i32 = arith.constant 0 : i32
    %c0_i32_0 = arith.constant 0 : i32
    %c0_i32_1 = arith.constant 0 : i32
    return %arg1, %c0_i32, %c0_i32_0 : i32, i32, i32
  }
  func.func @transform_4(%arg0: i32, %arg1: i32) -> (i32, i32) {
    %c0_i32 = arith.constant 0 : i32
    %c0_i32_0 = arith.constant 0 : i32
    %c0_i32_1 = arith.constant 0 : i32
    return %c0_i32, %c0_i32_0 : i32, i32
  }
  func.func @transform_5(%arg0: i32, %arg1: i32) -> (i32, i32, i32) {
    %c0_i32 = arith.constant 0 : i32
    %c0_i32_0 = arith.constant 0 : i32
    %c0_i32_1 = arith.constant 0 : i32
    return %arg0, %c0_i32, %c0_i32_0 : i32, i32, i32
  }
}

</mosaic_0001>

<bundles_post_ra>
// kernel: tpu_custom_call.1
= control target key start
LH: loop header
LB: loop body
LE: loop exit
PB: predicated region body
PF: predicated region fallthrough
CT: control target
= control target key end

     0   :  { %10 = vsyncpa [#allocation4], 0  ;;  %s1191_s0 = inlined_call_operand.vmem [shape: f32[2,8,32], index: 0, kind: input, shape index: {}]   ;;  %s1192_s1 = inlined_call_operand.vmem [shape: f32[4,32,24], index: 1, kind: input, shape index: {}]   ;;  %s1193_s2 = inlined_call_operand.vmem [shape: f32[4,1,24], index: 2, kind: input, shape index: {}]   ;;  %s1194_s3 = inlined_call_operand.vmem [shape: f32[4,8,32], index: 3, kind: input, shape index: {}]   ;;  %s1195_s4 = inlined_call_operand.vmem [shape: f32[1,32], index: 4, kind: input, shape index: {}]   ;;  %s1196_s5 = inlined_call_operand.hbm [shape: f32[2,8,32], index: 5, kind: output, shape index: {}]  }
   0x1   :  { %12 = vsyncpa [#allocation4 + $0x1], 0  ;;  %s1019_s18 = smov 0   ;;  %s1021_s19 = smov 0  }
   0x2   :  { %s1023_s20 = smov 0   ;;  %s1025_s21 = smov 0  }
   0x3   :  { %s1027_s22 = smov 0   ;;  %s1029_s23 = smov 0  }
   0x4   :  { %s1031_s24 = smov 0   ;;  %s1033_s25 = smov 0  }
   0x5 LB: > { %1202 = sst [smem:[#allocation6_spill]] %s961_s20  ;;  %s748_s26 = sadd.s32 4294967295, %s981_s25   ;;  %s981_s25 = sphi %s1033_s25, %s18_s25   ;;  %s977_s24 = sphi %s1031_s24, %s1216_s24   ;;  %s973_s23 = sphi %s1029_s23, %s1215_s23   ;;  %s969_s22 = sphi %s1027_s22, %s1214_s22   ;;  %s965_s21 = sphi %s1025_s21, %s1213_s21   ;;  %s961_s20 = sphi %s1023_s20, %s1212_s20   ;;  %s957_s19 = sphi %s1021_s19, %s1218_s19   ;;  %s953_s18 = sphi %s1019_s18, %s1217_s18  }
   0x6   : > { %1203 = sst [smem:[#allocation7_spill]] %s973_s23  ;;  %s749_s27 = sadd.s32 4294967294, %s981_s25  }
   0x7   : > { %1204 = sst [smem:[#allocation8_spill]] %s977_s24  ;;  %s27_s28 = sadd.s32 1, %s973_s23 }
   0x8   : > { %p28_p0 = scmp.ge.s32.totalorder %s27_s28, 4  ;;  %s30_s29 = sadd.s32 1, %s977_s24 }
   0x9   : > { %p172_p1 = scmp.ne.s32.totalorder %s961_s20, %s957_s19  ;;  %p173_p2 = scmp.eq.s32.totalorder %s748_s26, 7 }
   0xa   : > { %s1220_s28 = smov (%p28_p0, %s27_s28), 0  ;;  %s1222_s29 = smov (!%p28_p0, %s30_s29), %s977_s24 }
   0xb   : > { %1205 = sst [smem:[#allocation9_spill]] %s1220_s28  ;;  %p1068_p3 = por %p173_p2, %p172_p1 }
   0xc   : > { %p178_p4 = scmp.ne.s32.totalorder %s957_s19, %s953_s18  ;;  %p32_p5 = scmp.ge.s32.totalorder %s1222_s29, 2 }
   0xd   : > { %p179_p6 = scmp.eq.s32.totalorder %s749_s27, 7  ;;  %p752_p7 = scmp.ge.s32.totalorder %s981_s25, 1 }
   0xe   : > { %p228_p8 = scmp.lt.s32.totalorder %s981_s25, 9  ;;  %s1224_s29 = smov (%p32_p5, %s1222_s29), 0 }
   0xf   : > { %1207 = sst [smem:[#allocation10_spill]] %s1224_s29  ;;  %p1078_p9 = por %p179_p6, %p178_p4 }
  0x10   : > { %p229_p10 = pnand %p752_p7, %p228_p8  ;;  %s159_s7 = ssub.s32 %s977_s24, %s1224_s29 }
  0x11   : > { %s162_s8 = sadd.s32 1, %s961_s20  ;;  %p160_p11 = scmp.eq.s32.totalorder %s159_s7, 0 }
  0x12   : > { %232 = sbr.rel (%p229_p10) target bundleno = 1132 (0x46c), region = 40  ;;  %s1197_s10 = sand.u32 (!%p229_p10), 1, %s957_s19  }
  0x13   : > { %s1086_s9 = scalar_select %p160_p11, %s961_s20, %s162_s8  }
  0x14   : > { %p267_p12 = scmp.lt.s32.totalorder (!%p229_p10), %s969_s22, 1  ;;  %s1092_s11 = sshll.u32 (!%p229_p10), %s1197_s10, 3 }
  0x15   : > { %1209 = sst [smem:[#allocation11_spill]] %s1086_s9  ;;  %p271_p13 = scmp.lt.s32.totalorder (!%p229_p10), %s965_s21, 3 }
  0x16   : > { %p758_p0 = scmp.ne.s32.totalorder (!%p229_p10), %s965_s21, 0 }
  0x17   : > { %s268_s12 = scalar_select %p267_p12, %s969_s22, 1 }
  0x18   : > { %s1097_s13 = scalar_select %p271_p13, %s965_s21, 3 }
  0x19   : > { %s754_s14 = sshll.u32 %s268_s12, 3  ;;  %s266_s12 = scalar_lea.vmem [#allocation3], %s1092_s11 }
  0x1a   : > { %s270_s17 = scalar_lea.vmem %s1191_s0, %s754_s14  ;;  %s771_s26 = sshll.u32 %s1097_s13, 5 }
  0x1b   : > { %s275_s8 = scalar_lea.vmem %s1192_s1, %s771_s26  ;;  %s278_s28 = scalar_lea.vmem %s1193_s2, %s1097_s13 }
  0x1c   : > { %s757_s24 = sshll.u32 %s1097_s13, 3  ;;  %286 = sbr.rel (%p758_p0) target bundleno = 35 (0x23), region = 44 }
  0x1d   : > { %s1114_s20 = scalar_lea.vmem %s1194_s3, %s757_s24 }
  0x21   : > { %vm287_vm0 = vcmask 261120   ;;  %v983_v0 = vmov 0.0  }
  0x22   : > { %288 = vst.msk [vmem:[#allocation2] sm:$0xff] %vm287_vm0, %v983_v0 }
  0x23 PF: > { %v293_v1 = vld [vmem:[%s275_s8 + $0x18] sm:$0xff]  ;;  %v984_v2 = vmov 0.0   ;;  %v292_v3 = vld [vmem:[%s275_s8 + $0x10] sm:$0xff]  ;;  %vm985_vm1 = vmmov 0   ;;  %v291_v4 = vld [vmem:[%s275_s8 + $0x8] sm:$0xff]  ;;  %vm301_vm2 = vcmask 261120  }
  0x24   : > { %783 = vmatprep.subr.mxu0 %v984_v2  ;;  %791 = vmatprep.mubr.msk.f32.mxu0 %vm985_vm1, %v984_v2  ;;  %v290_v5 = vld [vmem:[%s275_s8] sm:$0xff]  ;;  %s986_s29 = smov 112   ;;  %s987_s9 = smov 120   ;;  %vm378_vm3 = vcmask 64512  }
  0x25   : > { %784 = vmatpush3.msra.mxu0 %v293_v1  ;;  %794 = vmatprep.subr.mxu1 %v984_v2  ;;  %v289_v6 = vld [vmem:[%s270_s17] sm:$0xff]  ;;  %p765_p1 = scmp.ne.s32.totalorder %s965_s21, 3 }
  0x26   : > { %785 = vmatprep.subr.mxu0 %v984_v2  ;;  %796 = vmatprep.mubr.msk.f32.mxu1 %vm985_vm1, %v984_v2  ;;  %v759_v7 = vld [vmem:[%s278_s28] ss:$0 sm:$0xff] }
  0x27   : > { %786 = vmatpush3.msra.mxu0 %v292_v3  ;;  %v541_v21 = vld [vmem:[%s1114_s20] sm:$0xff] }
  0x28   : > { %787 = vmatprep.subr.mxu0 %v984_v2 }
  0x29   : > { %788 = vmatpush3.msra.mxu0 %v291_v4  ;;  %v540_v27 = vld [vmem:[#allocation2] sm:$0xff] }
  0x2a   : > { %789 = vmatprep.subr.mxu0 %v984_v2 }
  0x2b   : > { %790 = vmatpush3.msra.mxu0 %v290_v5 }
  0x2c   : > { %792 = vmatmul.mubr.msk.f32.vlgmr.msra.gmra.mxu0 %vm301_vm2, %v289_v6  ;;  %804 = vmatprep.subr.mxu0 %v984_v2 }
  0x2d   : > { %806 = vmatprep.mubr.msk.f32.mxu0 %vm985_vm1, %v984_v2  ;;  %805 = vmatpush3.msra.mxu0 %v541_v21 }
  0xec   : > { %v371_v8 = vpop.f32.mrf.mxu0 }
  0xed   : > { %v372_v9 = vadd.f32 %v759_v7, %v371_v8 }
  0xee   : > { %v793_v10 = vpop.f32.mrf.mxu0 }
  0xef   : > { %463 = vrot.lane.b32.xlu1 %v372_v9, %s986_s29  ;;  %376 = vrot.lane.b32.xlu0 %v372_v9, %s987_s9 }
 0x161   : > { %v377_v11 = vpop.permute.xlu0 %376  ;;  %v464_v12 = vpop.permute.xlu1 %463 }
 0x162   : > { %795 = vmatpush3.xpose.msk.msra.mxu1 %vm378_vm3, %v377_v11 }
 0x163   : > { %799 = vmatprep.subr.mxu1 %v984_v2 }
 0x165   : > { %797 = vmatmul.mubr.msk.f32.vlgmr.msra.gmra.mxu1 %vm378_vm3, %v372_v9 }
 0x166   : > { %800 = vmatpush3.msra.mxu1 %v464_v12  ;;  %801 = vmatprep.mubr.msk.f32.mxu1 %vm985_vm1, %v984_v2 }
 0x225   : > { %v449_v13 = vpop.f32.mrf.mxu1 }
 0x226   : > { %v453_v14 = vsel %vm378_vm3, %v449_v13, -inf }
 0x227   : > { %454 = vmax.xlane.f32.xlu0 %v453_v14  ;;  %v798_v15 = vpop.f32.mrf.mxu1 }
 0x2b0   : > { %v455_v16 = vpop.xlane.xlu0 %454 }
 0x2b1   : > { %v456_v17 = vsub.f32 %v449_v13, %v455_v16 }
 0x2b3   : > { %v457_v18 = vmul.f32 1.442695, %v456_v17 }
 0x2b5   : > { %885 = vpow2.f32 %v457_v18 }
 0x2c2   : > { %v886_v19 = vpop.eup %885 }
 0x2c3   : > { %802 = vmatmul.mubr.msk.f32.vlgmr.msra.gmra.mxu1 %vm378_vm3, %v886_v19  ;;  %v459_v20 = vsel %vm378_vm3, %v886_v19, 0.0 }
 0x2c4   : > { %460 = vadd.xlane.f32.xlu1 %v459_v20 }
 0x34d   : > { %v461_v22 = vpop.xlane.xlu1 %460 }
 0x34e   : > { %887 = vrcp.f32 %v461_v22 }
 0x35b   : > { %v888_v23 = vpop.eup %887 }
 0x383   : > { %v535_v24 = vpop.f32.mrf.mxu1 }
 0x384   : > { %v539_v25 = vmul.f32 %v888_v23, %v535_v24 }
 0x385   : > { %v803_v26 = vpop.f32.mrf.mxu1 }
 0x386   : > { %807 = vmatmul.mubr.msk.f32.vlgmr.msra.gmra.mxu0 %vm378_vm3, %v539_v25 }
 0x445   : > { %620 = sbr.rel (%p765_p1) target bundleno = 1108 (0x454), region = 48 }
 0x446   : > { %v611_v28 = vpop.f32.mrf.mxu0 }
 0x447   : > { %v615_v29 = vadd.f32 %v611_v28, %v540_v27 }
 0x448   : > { %v808_v30 = vpop.f32.mrf.mxu0 }
 0x449   : > { %616 = vst.msk [vmem:[#allocation2] sm:$0xff] %vm301_vm2, %v615_v29 }
 0x44a   : > { %v766_v32 = vld [vmem:[%s1195_s4] ss:$0 sm:$0xff] }
 0x450   : > { %v621_v31 = vld [vmem:[#allocation2] sm:$0xff] }
 0x451   : > { %v629_v33 = vadd.f32 %v766_v32, %v621_v31 }
 0x453   : > { %630 = vst.msk [vmem:[%s266_s12] sm:$0xff] %vm301_vm2, %v629_v33 }
 0x454 PF: > { %s768_s10 = sshll.u32 %s969_s22, 7  ;;  %s645_s15 = sshll.u32 %s266_s12, 4  ;;  %s646_s15 = int_to_ptr.vmem [resolvable:$true] %s645_s15 }
 0x455   : > { %s643_s21 = scalar_lea.hbm %s1196_s5, %s768_s10  ;;  %s1210_s16 = sand.u32 1, %s957_s19  }
 0x456   : > { %s632_s17 = scalar_lea.sflag [#allocation4], %s1210_s16  ;;  %s889_s26 = scalar_lea.vmem %s646_s15, 128 }
 0x457   : > { %p890_p2 = scmp.ne.s32.totalorder %s646_s15, %s889_s26  ;;  %s988_s27 = smov [#allocation3]  }
 0x458   : > { %s893_s7 = sshll.u32 %s988_s27, 4  ;;  %s894_s7 = int_to_ptr.vmem [resolvable:$false] %s893_s7 }
 0x459   : > { %p891_p4 = pnand %p890_p2, %p1068_p3  ;;  %s895_s8 = scalar_lea.vmem %s894_s7, 256 }
 0x45a   : > { %p896_p6 = scmp.lt.s32.totalorder %s646_s15, %s894_s7  ;;  %p897_p7 = scmp.lt.s32.totalorder %s895_s8, %s889_s26 }
 0x45b   : > { %p892_p5 = pneg %p891_p4 }
 0x45c   : > { %p898_p8 = por %p897_p7, %p896_p6 }
 0x45e   : > { %p899_p10 = pnand %p898_p8, %p892_p5 }
 0x460   : > { %902 = shalt.err (!%p899_p10)
}
 0x461   : > { %s903_s22 = scalar_lea.hbm %s643_s21, 128  ;;  %s907_s23 = scalar_lea.hbm %s1196_s5, 256 }
 0x462   : > { %p904_p11 = scmp.ne.s32.totalorder %s643_s21, %s903_s22  ;;  %p908_p0 = scmp.lt.s32.totalorder %s643_s21, %s1196_s5 }
 0x463   : > { %p909_p1 = scmp.lt.s32.totalorder %s907_s23, %s903_s22 }
 0x464   : > { %p905_p12 = pnand %p904_p11, %p1068_p3 }
 0x465   : > { %p910_p2 = por %p909_p1, %p908_p0 }
 0x466   : > { %p906_p13 = pneg %p905_p12 }
 0x468   : > { %p911_p4 = pnand %p910_p2, %p906_p13 }
 0x46a   : > { %914 = shalt.err (!%p911_p4)
}
 0x46b   : > { %809 = dma.vmem_to_hbm [thread:$0]  (%p1068_p3), %s646_s15, 128, %s643_s21, %s632_s17  }
 0x46c PF: > { %p815_p5 = scmp.ge.s32.totalorder %s981_s25, 2  ;;  %s657_s9 = sand.u32 1, %s953_s18  }
 0x46d   : > { %s658_s20 = scalar_lea.sflag [#allocation4], %s657_s9 }
 0x46e   : > { %p812_p6 = pnand %p815_p5, %p1078_p9 }
 0x470   : > { %p813_p7 = pneg %p812_p6 }
 0x472   : > { %948 = dma.done.wait (%p813_p7), %s658_s20, 128  }
 0x473   : > { %950 = vsyncadd (%p813_p7), %s658_s20, 4294967168  ;;  %s18_s25 = sadd.s32 1, %s981_s25   ;;  %s1211_s28 = sld [smem:[#allocation6_spill]] }
 0x474   : > { %p15_p8 = scmp.ge.s32.totalorder %s18_s25, 10   ;;  %s1212_s20 = sld [smem:[#allocation11_spill]] }
 0x475   : > { %s1213_s21 = sld [smem:[#allocation7_spill]]  ;;  %s1217_s18 = smov %s957_s19 }
 0x476   : > { %s1214_s22 = sld [smem:[#allocation8_spill]]  ;;  %17 = sbr.rel (!%p15_p8) target bundleno = 5 (0x5), region = 92 }
 0x477   : > { %s1215_s23 = sld [smem:[#allocation9_spill]] }
 0x478   : > { %s1216_s24 = sld [smem:[#allocation10_spill]] }
 0x479   : > { %s1218_s19 = smov %s1211_s28 }
 0x47b   :  { %663 = vsyncpa [#allocation4], 1 }
 0x47c   :  { %665 = vsyncpa [#allocation4 + $0x1], 1 }

</bundles_post_ra>
